<compile_context>
chip_gen: v5e
topology: v5e:2x2
jax: 0.10.0
libtpu: 0.0.40
codegen_flags: <defaults>
</compile_context>

<pallas_src>
import functools
import math

import jax
import jax.numpy as jnp
from jax import lax
from jax.experimental import pallas as pl
from jax.experimental.pallas import tpu as pltpu

LANES = 128
# 8192 rows x 128 lanes x 4 B = 4 MiB per f32 input block.
# 2 inputs x 2 pipeline buffers = 16 MiB of stream buffers, well under the
# 48 MiB scoped-VMEM limit below (v7x physical VMEM is 64 MiB, v5e/v6e 128 MiB).
MAX_BLOCK_ROWS = 8192
# In-kernel compute chunk (keeps elementwise temporaries small).
CHUNK_ROWS = 1024
VMEM_LIMIT_BYTES = 48 * 1024 * 1024


@functools.lru_cache(maxsize=1)
def _core_split_config():
    """Returns (num_cores, leading-axis dimension semantics) for this chip."""
    kind = ""
    try:
        kind = jax.devices()[0].device_kind.lower()
    except Exception:  # defensive: no backend yet
        pass
    if "v7" in kind or "7x" in kind:
        # v7x: 2 TensorCores per chip.  Plain "parallel" often does not change
        # codegen; CORE_PARALLEL actually shards the grid axis across the TCs.
        return 2, getattr(pltpu, "CORE_PARALLEL", pltpu.PARALLEL)
    # v5e / v6e (single TensorCore): no split -> no redundant clamped-tile DMA.
    return 1, pltpu.ARBITRARY


def _logit(threshold):
    if threshold <= 0.0:
        return -float("inf")
    if threshold >= 1.0:
        return float("inf")
    return math.log(threshold / (1.0 - threshold))


def _make_iou_kernel(logit_thr, rows_total, tiles_per_split, block_rows):
    """Builds the kernel with all scalar parameters baked in as constants."""
    chunk_rows = min(CHUNK_ROWS, block_rows)
    n_full_chunks = block_rows // chunk_rows
    rem_rows = block_rows - n_full_chunks * chunk_rows

    def kernel(logits_ref, target_ref, inter_ref, total_ref,
               inter_acc, total_acc):
        c = pl.program_id(0)            # TensorCore split index
        i = pl.program_id(1)            # row-tile index within the split
        base_row = (c * tiles_per_split + i) * block_rows   # logical row offset

        @pl.when(i == 0)
        def _init():
            inter_acc[...] = jnp.zeros_like(inter_acc)
            total_acc[...] = jnp.zeros_like(total_acc)
            inter_ref[...] = jnp.zeros_like(inter_ref)
            total_ref[...] = jnp.zeros_like(total_ref)

        def accumulate_chunk(start, nrows, masked):
            # sigmoid(x) > t  <=>  x > logit(t): no transcendental, and the
            # comparisons stay in the native input dtypes.
            pred = logits_ref[pl.ds(start, nrows), :] > logit_thr
            targ = target_ref[pl.ds(start, nrows), :] > 0
            if masked:
                # Boundary / logically-empty tile: mask by global row index.
                r = lax.broadcasted_iota(jnp.int32, (nrows, LANES), 0)
                valid = (base_row + start + r) < rows_total
                pred = jnp.logical_and(pred, valid)
                targ = jnp.logical_and(targ, valid)
            inter_i = jnp.logical_and(pred, targ).astype(jnp.int32)
            both_i = pred.astype(jnp.int32) + targ.astype(jnp.int32)
            # Exact per-lane int32 partials; cross-lane reduce happens once,
            # in the epilogue.
            inter_acc[...] += jnp.sum(inter_i, axis=0, keepdims=True)
            total_acc[...] += jnp.sum(both_i, axis=0, keepdims=True)

        def process_tile(masked):
            if n_full_chunks == 1:
                accumulate_chunk(0, chunk_rows, masked)
            elif n_full_chunks > 1:
                def body(j, carry):
                    start = pl.multiple_of(j * chunk_rows, chunk_rows)
                    accumulate_chunk(start, chunk_rows, masked)
                    return carry
                lax.fori_loop(0, n_full_chunks, body, 0)
            if rem_rows > 0:
                accumulate_chunk(n_full_chunks * chunk_rows, rem_rows, masked)

        is_full = base_row + block_rows <= rows_total

        @pl.when(is_full)
        def _full_tile():
            process_tile(masked=False)

        @pl.when(jnp.logical_and(jnp.logical_not(is_full),
                                 base_row < rows_total))
        def _boundary_tile():
            process_tile(masked=True)

        @pl.when(i == tiles_per_split - 1)
        def _finalize():
            # Single cross-lane reduction per split; the host side only reads
            # element [0, 0] of each split's block.
            inter_ref[0:1, 0:1] = jnp.sum(
                inter_acc[...].astype(jnp.float32), axis=1, keepdims=True)
            total_ref[0:1, 0:1] = jnp.sum(
                total_acc[...].astype(jnp.float32), axis=1, keepdims=True)

    return kernel


@functools.partial(jax.jit, static_argnums=(2, 3, 4))
def _iou_metric_impl(output, target, threshold, smooth, max_block_rows):
    assert output.shape == target.shape
    n = output.size
    logit_thr = _logit(float(threshold))

    out_flat = output.reshape(-1)
    tgt_flat = target.reshape(-1)

    rows = n // LANES
    tail = n - rows * LANES

    inter = jnp.zeros((), jnp.float32)
    total = jnp.zeros((), jnp.float32)

    if rows > 0:
        n_aligned = rows * LANES
        if tail:
            # Aligned prefix only: no full-array padding copy is ever made; the
            # <128-element tail is folded in below.
            out2d = out_flat[:n_aligned].reshape(rows, LANES)
            tgt2d = tgt_flat[:n_aligned].reshape(rows, LANES)
        else:
            out2d = out_flat.reshape(rows, LANES)      # free reshape
            tgt2d = tgt_flat.reshape(rows, LANES)

        block_rows = rows if rows <= max_block_rows else max_block_rows
        num_tiles = pl.cdiv(rows, block_rows)

        num_cores, core_sem = _core_split_config()
        num_splits = num_cores if num_tiles >= num_cores else 1
        tiles_per_split = pl.cdiv(num_tiles, num_splits)
        leading_sem = core_sem if num_splits > 1 else pltpu.ARBITRARY

        def in_map(c, i):
            # Clamp so the DMA stays in range when num_tiles doesn't divide
            # evenly across splits; the kernel masks such tiles to zero.
            return (jnp.minimum(c * tiles_per_split + i, num_tiles - 1), 0)

        kernel = _make_iou_kernel(logit_thr, rows, tiles_per_split, block_rows)

        inter_blk, total_blk = pl.pallas_call(
            kernel,
            out_shape=(
                jax.ShapeDtypeStruct((num_splits * 8, LANES), jnp.float32),
                jax.ShapeDtypeStruct((num_splits * 8, LANES), jnp.float32),
            ),
            grid_spec=pltpu.PrefetchScalarGridSpec(
                num_scalar_prefetch=0,
                grid=(num_splits, tiles_per_split),
                in_specs=[
                    pl.BlockSpec((block_rows, LANES), in_map),
                    pl.BlockSpec((block_rows, LANES), in_map),
                ],
                out_specs=[
                    pl.BlockSpec((8, LANES), lambda c, i: (c, 0)),
                    pl.BlockSpec((8, LANES), lambda c, i: (c, 0)),
                ],
                scratch_shapes=[
                    pltpu.VMEM((1, LANES), jnp.int32),
                    pltpu.VMEM((1, LANES), jnp.int32),
                ],
            ),
            compiler_params=pltpu.CompilerParams(
                dimension_semantics=(leading_sem, pltpu.ARBITRARY),
                vmem_limit_bytes=VMEM_LIMIT_BYTES,
            ),
        )(out2d, tgt2d)

        # One scalar per split; fuses into the final scalar arithmetic (no
        # extra XLA reduction kernels over 16 KiB partial arrays).
        inter = inter + jnp.sum(
            inter_blk.reshape(num_splits, 8, LANES)[:, 0, 0])
        total = total + jnp.sum(
            total_blk.reshape(num_splits, 8, LANES)[:, 0, 0])

    if tail:
        # <128 leftover elements: tiny JAX-side reduction, no padded copy.
        tail_o = out_flat[rows * LANES:]
        tail_t = tgt_flat[rows * LANES:]
        pb = tail_o > logit_thr
        tb = tail_t > 0
        inter = inter + jnp.sum(jnp.logical_and(pb, tb)).astype(jnp.float32)
        total = total + (jnp.sum(pb) + jnp.sum(tb)).astype(jnp.float32)

    union = total - inter   # |A u B| = |A| + |B| - |A n B| for {0,1} masks
    # TODO(synk): PyTorch returns iou.item() (a host float); we return a jnp scalar.
    return (inter + float(smooth)) / (union + float(smooth))


def iou_metric(output, target, threshold=0.5, smooth=1e-5,
               max_block_rows=MAX_BLOCK_ROWS):
    """Binary-segmentation IoU, same semantics as the PyTorch IoUMetric.

    Pass logits in their native dtype (f32 or bf16) and targets as
    float / bool / uint8 -- nothing is up-cast in the wrapper, so narrower
    inputs stream proportionally fewer HBM bytes.
    """
    return _iou_metric_impl(output, target, float(threshold), float(smooth),
                            int(max_block_rows))


def _reference_iou(output, target, threshold=0.5, smooth=1e-5):
    ob = (jax.nn.sigmoid(output.astype(jnp.float32)) > threshold).astype(
        jnp.float32).ravel()
    tb = (target.astype(jnp.float32) > 0.0).astype(jnp.float32).ravel()
    inter = jnp.sum(ob * tb)
    union = jnp.sum(((ob + tb) > 0.0).astype(jnp.float32))
    return (inter + smooth) / (union + smooth)


if __name__ == "__main__":
    key = jax.random.PRNGKey(0)

    def check(out, tgt, **kw):
        got = iou_metric(out, tgt, **kw)
        jax.block_until_ready(got)
        ref = _reference_iou(out, tgt)
        assert jnp.allclose(got, ref, atol=1e-6, rtol=1e-6), (got, ref)

    # Primary small case (NCHW like the PyTorch module).
    k1, k2, key = jax.random.split(key, 3)
    output = jax.random.normal(k1, (2, 4, 16, 16), dtype=jnp.float32)
    target = (jax.random.uniform(k2, (2, 4, 16, 16)) > 0.5).astype(jnp.float32)
    check(output, target)

    # Ragged size (not a multiple of 128): exercises the JAX-side tail fold.
    k1, k2, key = jax.random.split(key, 3)
    output = jax.random.normal(k1, (2, 3, 17, 19), dtype=jnp.float32)
    target = (jax.random.uniform(k2, (2, 3, 17, 19)) > 0.5).astype(jnp.float32)
    check(output, target)

    # Narrow dtypes (bf16 logits, uint8 targets): no casts in the wrapper.
    k1, k2, key = jax.random.split(key, 3)
    output = jax.random.normal(k1, (2, 4, 32, 128), dtype=jnp.bfloat16)
    target = (jax.random.uniform(k2, (2, 4, 32, 128)) > 0.5).astype(jnp.uint8)
    check(output, target)

    # Multi-chunk case: exercises the in-kernel chunk loop + remainder chunk.
    k1, k2, key = jax.random.split(key, 3)
    output = jax.random.normal(k1, (1, 1, 384, 768), dtype=jnp.float32)
    target = (jax.random.uniform(k2, (1, 1, 384, 768)) > 0.5).astype(jnp.float32)
    check(output, target)

    # Multi-tile grid + partial boundary tile + tail, at small size via a
    # reduced max_block_rows override.
    k1, k2, key = jax.random.split(key, 3)
    output = jax.random.normal(k1, (2, 3, 25, 127), dtype=jnp.float32)
    target = (jax.random.uniform(k2, (2, 3, 25, 127)) > 0.5).astype(jnp.float32)
    check(output, target, max_block_rows=32)

    print("KERNEL_OK")
</pallas_src>

<mosaic_0001>
module attributes {stable_mosaic.version = 11 : i64} {
  func.func @kernel(%arg0: i32, %arg1: i32, %arg2: memref<16x128xf32, #tpu.memory_space<vmem>>, %arg3: memref<16x128xf32, #tpu.memory_space<vmem>>, %arg4: memref<8x128xf32, #tpu.memory_space<vmem>>, %arg5: memref<8x128xf32, #tpu.memory_space<vmem>>, %arg6: memref<1x128xi32, #tpu.memory_space<vmem>>, %arg7: memref<1x128xi32, #tpu.memory_space<vmem>>) attributes {dimension_semantics = [#tpu.dimension_semantics<arbitrary>, #tpu.dimension_semantics<arbitrary>], iteration_bounds = array<i64: 1, 1>, scalar_prefetch = 0 : i64, scratch_operands = 2 : i64, tpu.core_type = #tpu.core_type<tc>, window_params = [{transform_indices = @transform_0, window_bounds = array<i64: 16, 128>}, {transform_indices = @transform_1, window_bounds = array<i64: 16, 128>}, {transform_indices = @transform_2, window_bounds = array<i64: 8, 128>}, {transform_indices = @transform_3, window_bounds = array<i64: 8, 128>}]} {
    %c1_i32 = arith.constant 1 : i32
    %0 = arith.muli %arg0, %c1_i32 : i32
    %1 = arith.addi %0, %arg1 : i32
    %c16_i32 = arith.constant 16 : i32
    %2 = arith.muli %1, %c16_i32 : i32
    %c0_i32 = arith.constant 0 : i32
    %3 = arith.cmpi eq, %arg1, %c0_i32 : i32
    %4 = arith.extui %3 : i1 to i32
    %c0_i32_0 = arith.constant 0 : i32
    %5 = arith.cmpi ne, %4, %c0_i32_0 : i32
    scf.if %5 {
      %c0_i32_8 = arith.constant 0 : i32
      %18 = vector.broadcast %c0_i32_8 : i32 to vector<1x128xi32>
      %c0 = arith.constant 0 : index
      %c0_9 = arith.constant 0 : index
      %19 = vector.load %arg6[%c0, %c0_9] : memref<1x128xi32, #tpu.memory_space<vmem>>, vector<1x128xi32>
      tpu.vector_store %arg6[%c0, %c0_9], %18 {strides = array<i32>} : memref<1x128xi32, #tpu.memory_space<vmem>>, vector<1x128xi32>,
      %c0_i32_10 = arith.constant 0 : i32
      %20 = vector.broadcast %c0_i32_10 : i32 to vector<1x128xi32>
      %c0_11 = arith.constant 0 : index
      %c0_12 = arith.constant 0 : index
      %21 = vector.load %arg7[%c0_11, %c0_12] : memref<1x128xi32, #tpu.memory_space<vmem>>, vector<1x128xi32>
      tpu.vector_store %arg7[%c0_11, %c0_12], %20 {strides = array<i32>} : memref<1x128xi32, #tpu.memory_space<vmem>>, vector<1x128xi32>,
      %cst = arith.constant 0.000000e+00 : f32
      %22 = vector.broadcast %cst : f32 to vector<8x128xf32>
      %c0_13 = arith.constant 0 : index
      %c0_14 = arith.constant 0 : index
      %23 = vector.load %arg4[%c0_13, %c0_14] : memref<8x128xf32, #tpu.memory_space<vmem>>, vector<8x128xf32>
      tpu.vector_store %arg4[%c0_13, %c0_14], %22 {strides = array<i32>} : memref<8x128xf32, #tpu.memory_space<vmem>>, vector<8x128xf32>,
      %cst_15 = arith.constant 0.000000e+00 : f32
      %24 = vector.broadcast %cst_15 : f32 to vector<8x128xf32>
      %c0_16 = arith.constant 0 : index
      %c0_17 = arith.constant 0 : index
      %25 = vector.load %arg5[%c0_16, %c0_17] : memref<8x128xf32, #tpu.memory_space<vmem>>, vector<8x128xf32>
      tpu.vector_store %arg5[%c0_16, %c0_17], %24 {strides = array<i32>} : memref<8x128xf32, #tpu.memory_space<vmem>>, vector<8x128xf32>,
    } else {
    }
    %c16_i32_1 = arith.constant 16 : i32
    %6 = arith.addi %2, %c16_i32_1 : i32
    %c16_i32_2 = arith.constant 16 : i32
    %7 = arith.cmpi sle, %6, %c16_i32_2 : i32
    %8 = arith.extui %7 : i1 to i32
    %c0_i32_3 = arith.constant 0 : i32
    %9 = arith.cmpi ne, %8, %c0_i32_3 : i32
    scf.if %9 {
      %c0 = arith.constant 0 : index
      %c0_8 = arith.constant 0 : index
      %18 = vector.load %arg2[%c0, %c0_8] : memref<16x128xf32, #tpu.memory_space<vmem>>, vector<16x128xf32>
      %cst = arith.constant 0.000000e+00 : f32
      %19 = vector.broadcast %cst : f32 to vector<16x128xf32>
      %20 = arith.cmpf ogt, %18, %19 : vector<16x128xf32>
      %c0_9 = arith.constant 0 : index
      %c0_10 = arith.constant 0 : index
      %21 = vector.load %arg3[%c0_9, %c0_10] : memref<16x128xf32, #tpu.memory_space<vmem>>, vector<16x128xf32>
      %cst_11 = arith.constant 0.000000e+00 : f32
      %22 = vector.broadcast %cst_11 : f32 to vector<16x128xf32>
      %23 = arith.cmpf ogt, %21, %22 : vector<16x128xf32>
      %24 = arith.andi %20, %23 : vector<16x128xi1>
      %25 = arith.extui %24 : vector<16x128xi1> to vector<16x128xi32>
      %26 = arith.extui %20 : vector<16x128xi1> to vector<16x128xi32>
      %27 = arith.extui %23 : vector<16x128xi1> to vector<16x128xi32>
      %28 = arith.addi %26, %27 : vector<16x128xi32>
      %c0_12 = arith.constant 0 : index
      %c0_13 = arith.constant 0 : index
      %29 = vector.load %arg6[%c0_12, %c0_13] : memref<1x128xi32, #tpu.memory_space<vmem>>, vector<1x128xi32>
      %cst_14 = arith.constant dense<0> : vector<128xi32>
      %30 = vector.multi_reduction <add>, %25, %cst_14 [0] : vector<16x128xi32> to vector<128xi32>
      %31 = vector.shape_cast %30 : vector<128xi32> to vector<1x128xi32>
      %32 = arith.addi %29, %31 : vector<1x128xi32>
      %c0_15 = arith.constant 0 : index
      %c0_16 = arith.constant 0 : index
      %33 = vector.load %arg6[%c0_15, %c0_16] : memref<1x128xi32, #tpu.memory_space<vmem>>, vector<1x128xi32>
      tpu.vector_store %arg6[%c0_15, %c0_16], %32 {strides = array<i32>} : memref<1x128xi32, #tpu.memory_space<vmem>>, vector<1x128xi32>,
      %c0_17 = arith.constant 0 : index
      %c0_18 = arith.constant 0 : index
      %34 = vector.load %arg7[%c0_17, %c0_18] : memref<1x128xi32, #tpu.memory_space<vmem>>, vector<1x128xi32>
      %cst_19 = arith.constant dense<0> : vector<128xi32>
      %35 = vector.multi_reduction <add>, %28, %cst_19 [0] : vector<16x128xi32> to vector<128xi32>
      %36 = vector.shape_cast %35 : vector<128xi32> to vector<1x128xi32>
      %37 = arith.addi %34, %36 : vector<1x128xi32>
      %c0_20 = arith.constant 0 : index
      %c0_21 = arith.constant 0 : index
      %38 = vector.load %arg7[%c0_20, %c0_21] : memref<1x128xi32, #tpu.memory_space<vmem>>, vector<1x128xi32>
      tpu.vector_store %arg7[%c0_20, %c0_21], %37 {strides = array<i32>} : memref<1x128xi32, #tpu.memory_space<vmem>>, vector<1x128xi32>,
    } else {
    }
    %true = arith.constant true
    %10 = arith.xori %7, %true : i1
    %c16_i32_4 = arith.constant 16 : i32
    %11 = arith.cmpi slt, %2, %c16_i32_4 : i32
    %12 = arith.andi %10, %11 : i1
    %13 = arith.extui %12 : i1 to i32
    %c0_i32_5 = arith.constant 0 : i32
    %14 = arith.cmpi ne, %13, %c0_i32_5 : i32
    scf.if %14 {
      %c0 = arith.constant 0 : index
      %c0_8 = arith.constant 0 : index
      %18 = vector.load %arg2[%c0, %c0_8] : memref<16x128xf32, #tpu.memory_space<vmem>>, vector<16x128xf32>
      %cst = arith.constant 0.000000e+00 : f32
      %19 = vector.broadcast %cst : f32 to vector<16x128xf32>
      %20 = arith.cmpf ogt, %18, %19 : vector<16x128xf32>
      %c0_9 = arith.constant 0 : index
      %c0_10 = arith.constant 0 : index
      %21 = vector.load %arg3[%c0_9, %c0_10] : memref<16x128xf32, #tpu.memory_space<vmem>>, vector<16x128xf32>
      %cst_11 = arith.constant 0.000000e+00 : f32
      %22 = vector.broadcast %cst_11 : f32 to vector<16x128xf32>
      %23 = arith.cmpf ogt, %21, %22 : vector<16x128xf32>
      %24 = tpu.iota {dimensions = array<i32: 0>} : vector<16x128xi32>
      %c0_i32_12 = arith.constant 0 : i32
      %25 = arith.addi %2, %c0_i32_12 : i32
      %26 = vector.broadcast %25 : i32 to vector<16x128xi32>
      %27 = arith.addi %26, %24 : vector<16x128xi32>
      %c16_i32_13 = arith.constant 16 : i32
      %28 = vector.broadcast %c16_i32_13 : i32 to vector<16x128xi32>
      %29 = arith.cmpi slt, %27, %28 : vector<16x128xi32>
      %30 = arith.andi %20, %29 : vector<16x128xi1>
      %31 = arith.andi %23, %29 : vector<16x128xi1>
      %32 = arith.andi %30, %31 : vector<16x128xi1>
      %33 = arith.extui %32 : vector<16x128xi1> to vector<16x128xi32>
      %34 = arith.extui %30 : vector<16x128xi1> to vector<16x128xi32>
      %35 = arith.extui %31 : vector<16x128xi1> to vector<16x128xi32>
      %36 = arith.addi %34, %35 : vector<16x128xi32>
      %c0_14 = arith.constant 0 : index
      %c0_15 = arith.constant 0 : index
      %37 = vector.load %arg6[%c0_14, %c0_15] : memref<1x128xi32, #tpu.memory_space<vmem>>, vector<1x128xi32>
      %cst_16 = arith.constant dense<0> : vector<128xi32>
      %38 = vector.multi_reduction <add>, %33, %cst_16 [0] : vector<16x128xi32> to vector<128xi32>
      %39 = vector.shape_cast %38 : vector<128xi32> to vector<1x128xi32>
      %40 = arith.addi %37, %39 : vector<1x128xi32>
      %c0_17 = arith.constant 0 : index
      %c0_18 = arith.constant 0 : index
      %41 = vector.load %arg6[%c0_17, %c0_18] : memref<1x128xi32, #tpu.memory_space<vmem>>, vector<1x128xi32>
      tpu.vector_store %arg6[%c0_17, %c0_18], %40 {strides = array<i32>} : memref<1x128xi32, #tpu.memory_space<vmem>>, vector<1x128xi32>,
      %c0_19 = arith.constant 0 : index
      %c0_20 = arith.constant 0 : index
      %42 = vector.load %arg7[%c0_19, %c0_20] : memref<1x128xi32, #tpu.memory_space<vmem>>, vector<1x128xi32>
      %cst_21 = arith.constant dense<0> : vector<128xi32>
      %43 = vector.multi_reduction <add>, %36, %cst_21 [0] : vector<16x128xi32> to vector<128xi32>
      %44 = vector.shape_cast %43 : vector<128xi32> to vector<1x128xi32>
      %45 = arith.addi %42, %44 : vector<1x128xi32>
      %c0_22 = arith.constant 0 : index
      %c0_23 = arith.constant 0 : index
      %46 = vector.load %arg7[%c0_22, %c0_23] : memref<1x128xi32, #tpu.memory_space<vmem>>, vector<1x128xi32>
      tpu.vector_store %arg7[%c0_22, %c0_23], %45 {strides = array<i32>} : memref<1x128xi32, #tpu.memory_space<vmem>>, vector<1x128xi32>,
    } else {
    }
    %c0_i32_6 = arith.constant 0 : i32
    %15 = arith.cmpi eq, %arg1, %c0_i32_6 : i32
    %16 = arith.extui %15 : i1 to i32
    %c0_i32_7 = arith.constant 0 : i32
    %17 = arith.cmpi ne, %16, %c0_i32_7 : i32
    scf.if %17 {
      %c0 = arith.constant 0 : index
      %c0_8 = arith.constant 0 : index
      %18 = vector.load %arg6[%c0, %c0_8] : memref<1x128xi32, #tpu.memory_space<vmem>>, vector<1x128xi32>
      %19 = arith.sitofp %18 : vector<1x128xi32> to vector<1x128xf32>
      %cst = arith.constant dense<0.000000e+00> : vector<1xf32>
      %20 = vector.multi_reduction <add>, %19, %cst [1] : vector<1x128xf32> to vector<1xf32>
      %21 = vector.shape_cast %20 : vector<1xf32> to vector<1x1xf32>
      %c0_9 = arith.constant 0 : index
      %c0_10 = arith.constant 0 : index
      %22 = vector.load %arg4[%c0_9, %c0_10] : memref<8x128xf32, #tpu.memory_space<vmem>>, vector<1x1xf32>
      tpu.vector_store %arg4[%c0_9, %c0_10], %21 {strides = array<i32>} : memref<8x128xf32, #tpu.memory_space<vmem>>, vector<1x1xf32>,
      %c0_11 = arith.constant 0 : index
      %c0_12 = arith.constant 0 : index
      %23 = vector.load %arg7[%c0_11, %c0_12] : memref<1x128xi32, #tpu.memory_space<vmem>>, vector<1x128xi32>
      %24 = arith.sitofp %23 : vector<1x128xi32> to vector<1x128xf32>
      %cst_13 = arith.constant dense<0.000000e+00> : vector<1xf32>
      %25 = vector.multi_reduction <add>, %24, %cst_13 [1] : vector<1x128xf32> to vector<1xf32>
      %26 = vector.shape_cast %25 : vector<1xf32> to vector<1x1xf32>
      %c0_14 = arith.constant 0 : index
      %c0_15 = arith.constant 0 : index
      %27 = vector.load %arg5[%c0_14, %c0_15] : memref<8x128xf32, #tpu.memory_space<vmem>>, vector<1x1xf32>
      tpu.vector_store %arg5[%c0_14, %c0_15], %26 {strides = array<i32>} : memref<8x128xf32, #tpu.memory_space<vmem>>, vector<1x1xf32>,
    } else {
    }
    return
  }
  func.func @transform_0(%arg0: i32, %arg1: i32) -> (i32, i32) {
    %c1_i32 = arith.constant 1 : i32
    %0 = arith.muli %arg0, %c1_i32 : i32
    %1 = arith.addi %0, %arg1 : i32
    %c0_i32 = arith.constant 0 : i32
    %2 = arith.minsi %1, %c0_i32 : i32
    %c0_i32_0 = arith.constant 0 : i32
    %c0_i32_1 = arith.constant 0 : i32
    return %2, %c0_i32_0 : i32, i32
  }
  func.func @transform_1(%arg0: i32, %arg1: i32) -> (i32, i32) {
    %c1_i32 = arith.constant 1 : i32
    %0 = arith.muli %arg0, %c1_i32 : i32
    %1 = arith.addi %0, %arg1 : i32
    %c0_i32 = arith.constant 0 : i32
    %2 = arith.minsi %1, %c0_i32 : i32
    %c0_i32_0 = arith.constant 0 : i32
    %c0_i32_1 = arith.constant 0 : i32
    return %2, %c0_i32_0 : i32, i32
  }
  func.func @transform_2(%arg0: i32, %arg1: i32) -> (i32, i32) {
    %c0_i32 = arith.constant 0 : i32
    %c0_i32_0 = arith.constant 0 : i32
    return %arg0, %c0_i32 : i32, i32
  }
  func.func @transform_3(%arg0: i32, %arg1: i32) -> (i32, i32) {
    %c0_i32 = arith.constant 0 : i32
    %c0_i32_0 = arith.constant 0 : i32
    return %arg0, %c0_i32 : i32, i32
  }
}

</mosaic_0001>

<bundles_post_ra>
// kernel: _iou_metric_impl.1
= control target key start
LH: loop header
LB: loop body
LE: loop exit
PB: predicated region body
PF: predicated region fallthrough
CT: control target
= control target key end

     0   :  { %v225_v0 = vmov 0   ;;  %v226_v18 = vmov 0.0   ;;  %vm191_vm6 = vcmask 1040384   ;;  %vm195_vm7 = vcmask 0   ;;  %s271_s0 = inlined_call_operand.vmem [shape: f32[16,128], index: 0, kind: input, shape index: {}]   ;;  %s272_s1 = inlined_call_operand.vmem [shape: f32[16,128], index: 1, kind: input, shape index: {}]   ;;  %s273_s2 = inlined_call_operand.vmem [shape: f32[8,128], index: 2, kind: output, shape index: {0}]   ;;  %s274_s3 = inlined_call_operand.vmem [shape: f32[8,128], index: 3, kind: output, shape index: {1}]  }
   0x1   :  { %83 = vst [vmem:[#allocation2] sm:$0x1] %v225_v0  ;;  %v92_v1 = vld [vmem:[%s271_s0] sm:$0xff]  ;;  %v93_v2 = vld [vmem:[%s271_s0 + $0x8] sm:$0xff] }
   0x2   :  { %v96_v3 = vld [vmem:[%s272_s1] sm:$0xff]  ;;  %vm94_vm0 = vcmp.gt.f32.partialorder %v92_v1, 0.0  ;;  %vm95_vm1 = vcmp.gt.f32.partialorder %v93_v2, 0.0  ;;  %v97_v4 = vld [vmem:[%s272_s1 + $0x8] sm:$0xff]  ;;  %84 = vst [vmem:[#allocation3] sm:$0x1] %v225_v0 }
   0x3   :  { %vm98_vm2 = vcmp.gt.f32.partialorder %v96_v3, 0.0  ;;  %vm99_vm3 = vcmp.gt.f32.partialorder %v97_v4, 0.0  ;;  %v104_v5 = vsel %vm94_vm0, 1, %v225_v0  ;;  %v105_v6 = vsel %vm95_vm1, 1, %v225_v0  ;;  %85 = vst [vmem:[%s273_s2] sm:$0xff] %v226_v18 }
   0x4   :  { %vm100_vm4 = vmand %vm94_vm0, %vm98_vm2  ;;  %v106_v7 = vsel %vm98_vm2, 1, %v225_v0  ;;  %v107_v9 = vsel %vm99_vm3, 1, %v225_v0  ;;  %86 = vst [vmem:[%s274_s3] sm:$0xff] %v226_v18 }
   0x5   :  { %vm101_vm5 = vmand %vm95_vm1, %vm99_vm3  ;;  %v102_v8 = vsel %vm100_vm4, 1, %v225_v0  ;;  %v108_v10 = vadd.s32 %v106_v7, %v104_v5  ;;  %v109_v12 = vadd.s32 %v107_v9, %v105_v6 }
   0x6   :  { %v103_v11 = vsel %vm101_vm5, 1, %v225_v0 }
   0x7   :  { %v111_v13 = vadd.s32 %v103_v11, %v102_v8  ;;  %v121_v14 = vadd.s32 %v109_v12, %v108_v10 }
   0x8   :  { %v110_v25 = vld [vmem:[#allocation2] sm:$0x1] }
   0x9   :  { %v112_v15 = vrot.slane %v111_v13, 4  ;;  %v122_v16 = vrot.slane %v121_v14, 4  ;;  %v120_v28 = vld [vmem:[#allocation3] sm:$0x1] }
   0xb   :  { %v113_v17 = vadd.s32 %v112_v15, %v111_v13  ;;  %v123_v19 = vadd.s32 %v122_v16, %v121_v14 }
   0xd   :  { %v114_v20 = vrot.slane %v113_v17, 2  ;;  %v124_v21 = vrot.slane %v123_v19, 2 }
   0xf   :  { %v115_v22 = vadd.s32 %v114_v20, %v113_v17  ;;  %v125_v23 = vadd.s32 %v124_v21, %v123_v19 }
  0x11   :  { %v116_v24 = vrot.slane %v115_v22, 1  ;;  %v126_v26 = vrot.slane %v125_v23, 1 }
  0x13   :  { %v117_v27 = vadd.s32 %v116_v24, %v115_v22  ;;  %v127_v29 = vadd.s32 %v126_v26, %v125_v23 }
  0x15   :  { %v118_v30 = vadd.s32 %v117_v27, %v110_v25  ;;  %v128_v31 = vadd.s32 %v127_v29, %v120_v28 }
  0x17   :  { %119 = vst [vmem:[#allocation2] sm:$0x1] %v118_v30 }
  0x18   :  { %129 = vst [vmem:[#allocation3] sm:$0x1] %v128_v31 }
  0x1e   :  { %v189_v32 = vld [vmem:[#allocation2] sm:$0x1] }
  0x1f   :  { %v190_v33 = vcvt.s32.f32 %v189_v32  ;;  %v197_v34 = vld [vmem:[#allocation3] sm:$0x1] }
  0x20   :  { %v198_v36 = vcvt.s32.f32 %v197_v34 }
  0x21   :  { %v192_v35 = vsel %vm191_vm6, %v190_v33, 0.0 }
  0x22   :  { %193 = vadd.xlane.f32.xlu0 %v192_v35  ;;  %v199_v37 = vsel %vm191_vm6, %v198_v36, 0.0 }
  0x2a   :  { %200 = vadd.xlane.f32.xlu0 %v199_v37 }
  0x95   :  { %v194_v38 = vpop.xlane.xlu0 %193 }
  0x96   :  { %196 = vst.msk [vmem:[%s273_s2] sm:$0x1] %vm195_vm7, %v194_v38 }
  0x9d   :  { %v201_v39 = vpop.xlane.xlu0 %200 }
  0x9e   :  { %202 = vst.msk [vmem:[%s274_s3] sm:$0x1] %vm195_vm7, %v201_v39 }

</bundles_post_ra>
